<compile_context>
chip_gen: v7x
topology: tpu7x:2x2x1
jax: 0.10.0
libtpu: 0.0.40
codegen_flags: <defaults>
</compile_context>

<pallas_src>
import functools

import numpy as np
import jax
import jax.numpy as jnp
from jax.experimental import pallas as pl
from jax.experimental.pallas import tpu as pltpu

LANE = 128


def _round_up(x, m):
    return -(-x // m) * m


def _conv_bn_kernel(x_ref, halo_ref, w_ref, shift_ref, o_ref, *, K, dilation, TC):
    """One (batch, L-tile) grid step: dense (stride-1) conv taps + folded BN shift.

    x_ref:     (1, C_in, TL)        padded-input lanes [j*TL, (j+1)*TL)
    halo_ref:  (1, C_in, HALO_BLK)  padded-input lanes [(j+1)*TL, (j+1)*TL + HALO_BLK)
    w_ref:     (K, C_out, C_in)     conv weight with the BN scale folded in
    shift_ref: (C_out, 1) f32       beta - running_mean * scale
    o_ref:     (1, C_out, TL)
    """
    C_in = x_ref.shape[1]
    C_out, TL = o_ref.shape[1], o_ref.shape[2]
    halo = (K - 1) * dilation
    shift = shift_ref[...]                           # (C_out, 1) f32, hoisted load

    # Static unroll over lane chunks: keeps live values a few vregs wide even
    # when TL is sized for ~1 MiB of HBM traffic per grid step.
    for lo in range(0, TL, TC):
        cw = min(TC, TL - lo)                        # chunk width (multiple of 128)
        if lo + cw + halo <= TL:                     # window fully inside main block
            xw = x_ref[0, :, lo:lo + cw + halo]
        else:                                        # crosses tile edge -> append halo
            xw = jnp.concatenate([x_ref[0, :, lo:TL], halo_ref[0]], axis=-1)
        acc = jnp.zeros((C_out, cw), jnp.float32)
        for k in range(K):                           # static unroll over taps
            xs = jax.lax.slice(xw, (0, k * dilation), (C_in, k * dilation + cw))
            acc = acc + jnp.dot(w_ref[k], xs, preferred_element_type=jnp.float32)
        o_ref[0, :, lo:lo + cw] = (acc + shift).astype(o_ref.dtype)


def basic_conv1d(x_ncl, weight, gamma, beta, running_mean, running_var, *,
                 stride=1, padding=0, dilation=1, eps=1e-5,
                 tile_l=None, compute_dtype=jnp.bfloat16, out_dtype=None,
                 vmem_budget_bytes=12 * 1024 * 1024, vmem_limit_bytes=None):
    """Forward of BasicConv1d: BatchNorm1d(Conv1d(x)), conv has no bias.

    x_ncl: (N, C_in, L) PyTorch layout.  weight: (C_out, C_in, K).
    Returns (N, C_out, L_out) in PyTorch NCL layout (native output of the kernel).
    BatchNorm is applied in inference mode (running statistics) and folded into
    the conv weight (scale) plus a per-channel shift inside the kernel.
    """
    N, C_in, L = x_ncl.shape
    C_out, _, K = weight.shape
    halo = (K - 1) * dilation
    L_out = (L + 2 * padding - halo - 1) // stride + 1
    L_dense = L + 2 * padding - halo              # stride-1 ("dense") output length
    assert L_out >= 1 and L_dense >= 1
    out_dtype = x_ncl.dtype if out_dtype is None else out_dtype

    HALO_BLK = max(LANE, _round_up(max(halo, 1), LANE))   # lane-aligned halo block
    ALIGN = HALO_BLK                                      # TL must divide into halo blocks
    TC = 512                                              # in-kernel lane chunk

    in_sz = np.dtype(compute_dtype).itemsize
    out_sz = np.dtype(out_dtype).itemsize

    def _sub(c, itemsize):            # physical sublane padding of a channel dim
        return _round_up(max(c, 1), 8 * max(1, 4 // itemsize))

    def _vmem_bytes(tl):              # physical (8|16,128)-padded per-step footprint
        main = _sub(C_in, in_sz) * tl * in_sz
        halo_b = _sub(C_in, in_sz) * HALO_BLK * in_sz
        out_b = _sub(C_out, out_sz) * tl * out_sz
        w_b = K * _sub(C_out, in_sz) * LANE * in_sz
        sh_b = 8 * LANE * 4
        chunk = (_sub(C_in, 4) * (TC + HALO_BLK) + 2 * _sub(C_out, 4) * TC) * 4
        return 2 * (main + halo_b + out_b + w_b + sh_b) + 4 * chunk

    # ---- L tile: ~1 MiB of real HBM traffic per grid step, capped by L, by a
    # ---- minimum grid-step count (megacore when N is small), and by VMEM.
    if tile_l is None:
        bytes_per_pos = C_in * in_sz + C_out * out_sz
        TL = max(ALIGN, ((1 << 20) // bytes_per_pos) // ALIGN * ALIGN)
        TL = min(TL, 32768)
    else:
        TL = _round_up(max(int(tile_l), 1), ALIGN)
    TL = min(TL, _round_up(L_dense, ALIGN))
    if tile_l is None:
        j_min = max(1, 8 // max(N, 1))
        TL = min(TL, max(ALIGN, _round_up(-(-L_dense // j_min), ALIGN)))
    while TL > ALIGN and _vmem_bytes(TL) > vmem_budget_bytes:
        TL -= ALIGN

    J = -(-L_dense // TL)
    L_dense_pad = J * TL
    L_in_total = J * TL + HALO_BLK
    pad_right = L_in_total - padding - L
    assert pad_right >= 0

    # Single wrapper pass over the input: zero-pad along L + cast.  No transpose.
    x_pad = jnp.pad(x_ncl, ((0, 0), (0, 0), (padding, pad_right))).astype(compute_dtype)

    # Fold inference-mode BN into the conv: weight *= scale, epilogue is `+ shift`.
    inv = (gamma / jnp.sqrt(running_var + eps)).astype(jnp.float32)
    w_fold = weight.astype(jnp.float32) * inv[:, None, None]            # (C_out, C_in, K)
    w_koc = jnp.transpose(w_fold, (2, 0, 1)).astype(compute_dtype)      # (K, C_out, C_in)
    shift = (beta - running_mean * inv).reshape(C_out, 1).astype(jnp.float32)

    kernel = functools.partial(_conv_bn_kernel, K=K, dilation=dilation, TC=TC)
    halo_blocks_per_tile = TL // HALO_BLK

    y_dense = pl.pallas_call(
        kernel,
        out_shape=jax.ShapeDtypeStruct((N, C_out, L_dense_pad), out_dtype),
        grid_spec=pltpu.PrefetchScalarGridSpec(
            num_scalar_prefetch=0,
            grid=(N, J),
            in_specs=[
                # main input tile: lanes [j*TL, (j+1)*TL) of batch row n
                pl.BlockSpec((1, C_in, TL), lambda n, j: (n, 0, j)),
                # lane-aligned halo block starting right after the main tile
                pl.BlockSpec((1, C_in, HALO_BLK),
                             lambda n, j: (n, 0, (j + 1) * halo_blocks_per_tile)),
                pl.BlockSpec((K, C_out, C_in), lambda n, j: (0, 0, 0)),
                pl.BlockSpec((C_out, 1), lambda n, j: (0, 0)),
            ],
            out_specs=pl.BlockSpec((1, C_out, TL), lambda n, j: (n, 0, j)),
        ),
        compiler_params=pltpu.CompilerParams(
            dimension_semantics=("parallel", "parallel"),
            vmem_limit_bytes=vmem_limit_bytes),
    )(x_pad, x_pad, w_koc, shift)

    if stride == 1:
        return y_dense[:, :, :L_out]
    # Strided configs: exact subsample of the dense output (see TODO above).
    return y_dense[:, :, :(L_out - 1) * stride + 1:stride]


def _reference(x_ncl, weight, gamma, beta, running_mean, running_var,
               *, stride, padding, dilation, eps=1e-5):
    y = jax.lax.conv_general_dilated(
        x_ncl, weight, window_strides=(stride,), padding=[(padding, padding)],
        rhs_dilation=(dilation,), dimension_numbers=("NCH", "OIH", "NCH"),
        precision=jax.lax.Precision.HIGHEST)
    inv = 1.0 / jnp.sqrt(running_var + eps)
    return (y - running_mean[None, :, None]) * (gamma * inv)[None, :, None] \
        + beta[None, :, None]


if __name__ == "__main__":
    key = jax.random.PRNGKey(0)

    def make_case(k, N, C_in, C_out, L, K):
        kx, kw, kg, kb, km, kv = jax.random.split(k, 6)
        x = jax.random.normal(kx, (N, C_in, L), jnp.float32)
        w = jax.random.normal(kw, (C_out, C_in, K), jnp.float32) * 0.2
        g = jax.random.normal(kg, (C_out,), jnp.float32) * 0.1 + 1.0
        b = jax.random.normal(kb, (C_out,), jnp.float32) * 0.1
        m = jax.random.normal(km, (C_out,), jnp.float32) * 0.1
        v = jax.random.uniform(kv, (C_out,), jnp.float32, 0.5, 1.5)
        return x, w, g, b, m, v

    k1, k2, k3 = jax.random.split(key, 3)

    # --- Case 1: canonical small BasicConv1d config (stride 1, pad 1).
    x, w, g, b, m, v = make_case(k1, N=2, C_in=4, C_out=8, L=16, K=3)
    conv_kw = dict(stride=1, padding=1, dilation=1)
    ref = _reference(x, w, g, b, m, v, **conv_kw)

    out = jax.block_until_ready(
        basic_conv1d(x, w, g, b, m, v, **conv_kw, compute_dtype=jnp.float32))
    assert out.shape == ref.shape
    assert jnp.allclose(out, ref, atol=1e-4, rtol=1e-4)

    # bf16 matmul operands (f32 accumulator / BN shift).
    out_bf = jax.block_until_ready(
        basic_conv1d(x, w, g, b, m, v, **conv_kw, compute_dtype=jnp.bfloat16))
    assert jnp.allclose(out_bf, ref, atol=5e-2, rtol=5e-2)

    # bf16 output stream (halves the dominant HBM write, biggest v5e lever).
    out_bf_o = jax.block_until_ready(
        basic_conv1d(x, w, g, b, m, v, **conv_kw,
                     compute_dtype=jnp.bfloat16, out_dtype=jnp.bfloat16))
    assert out_bf_o.dtype == jnp.bfloat16
    assert jnp.allclose(out_bf_o.astype(jnp.float32), ref, atol=6e-2, rtol=6e-2)

    # --- Case 2: multi-tile grid along L (exercises the halo block across tiles
    # --- and the ragged last tile).
    x, w, g, b, m, v = make_case(k2, N=2, C_in=4, C_out=8, L=700, K=3)
    conv_kw = dict(stride=1, padding=1, dilation=1)
    ref = _reference(x, w, g, b, m, v, **conv_kw)
    out = jax.block_until_ready(
        basic_conv1d(x, w, g, b, m, v, **conv_kw, tile_l=256,
                     compute_dtype=jnp.float32))
    assert out.shape == ref.shape
    assert jnp.allclose(out, ref, atol=1e-4, rtol=1e-4)

    # --- Case 3: strided / dilated config (dense compute + wrapper subsample).
    x, w, g, b, m, v = make_case(k3, N=2, C_in=4, C_out=8, L=37, K=3)
    conv_kw = dict(stride=2, padding=2, dilation=2)
    ref = _reference(x, w, g, b, m, v, **conv_kw)
    out = jax.block_until_ready(
        basic_conv1d(x, w, g, b, m, v, **conv_kw, compute_dtype=jnp.float32))
    assert out.shape == ref.shape
    assert jnp.allclose(out, ref, atol=1e-4, rtol=1e-4)

    print("KERNEL_OK")
</pallas_src>

<mosaic_0001>
module attributes {stable_mosaic.version = 11 : i64} {
  func.func @_conv_bn_kernel(%arg0: i32, %arg1: i32, %arg2: memref<1x4x128xf32, #tpu.memory_space<vmem>>, %arg3: memref<1x4x128xf32, #tpu.memory_space<vmem>>, %arg4: memref<3x8x4xf32, #tpu.memory_space<vmem>>, %arg5: memref<8x1xf32, #tpu.memory_space<vmem>>, %arg6: memref<1x8x128xf32, #tpu.memory_space<vmem>>) attributes {dimension_semantics = [#tpu.dimension_semantics<parallel>, #tpu.dimension_semantics<parallel>], iteration_bounds = array<i64: 2, 1>, scalar_prefetch = 0 : i64, scratch_operands = 0 : i64, tpu.core_type = #tpu.core_type<tc>, window_params = [{transform_indices = @transform_0, window_bounds = array<i64: 1, 4, 128>}, {transform_indices = @transform_1, window_bounds = array<i64: 1, 4, 128>}, {pipeline_mode = #tpu.pipeline_mode<synchronous>, transform_indices = @transform_2, window_bounds = array<i64: 3, 8, 4>}, {pipeline_mode = #tpu.pipeline_mode<synchronous>, transform_indices = @transform_3, window_bounds = array<i64: 8, 1>}, {transform_indices = @transform_4, window_bounds = array<i64: 1, 8, 128>}]} {
    %c0 = arith.constant 0 : index
    %c0_0 = arith.constant 0 : index
    %0 = vector.load %arg5[%c0, %c0_0] : memref<8x1xf32, #tpu.memory_space<vmem>>, vector<8x1xf32>
    %c0_1 = arith.constant 0 : index
    %c0_2 = arith.constant 0 : index
    %c0_3 = arith.constant 0 : index
    %1 = vector.load %arg2[%c0_1, %c0_2, %c0_3] : memref<1x4x128xf32, #tpu.memory_space<vmem>>, vector<1x4x128xf32>
    %2 = vector.shape_cast %1 : vector<1x4x128xf32> to vector<4x128xf32>
    %c0_4 = arith.constant 0 : index
    %c0_5 = arith.constant 0 : index
    %c0_6 = arith.constant 0 : index
    %3 = vector.load %arg3[%c0_4, %c0_5, %c0_6] : memref<1x4x128xf32, #tpu.memory_space<vmem>>, vector<1x4x128xf32>
    %4 = vector.shape_cast %3 : vector<1x4x128xf32> to vector<4x128xf32>
    %5 = tpu.concatenate %2, %4 in 1 : vector<4x128xf32>, vector<4x128xf32> -> vector<4x256xf32>
    %cst = arith.constant 0.000000e+00 : f32
    %6 = vector.broadcast %cst : f32 to vector<8x128xf32>
    %7 = vector.extract_strided_slice %5 {offsets = [0, 0], sizes = [4, 128], strides = [1, 1]} : vector<4x256xf32> to vector<4x128xf32>
    %c0_7 = arith.constant 0 : index
    %c0_8 = arith.constant 0 : index
    %c0_9 = arith.constant 0 : index
    %8 = vector.load %arg4[%c0_7, %c0_8, %c0_9] : memref<3x8x4xf32, #tpu.memory_space<vmem>>, vector<1x8x4xf32>
    %9 = vector.shape_cast %8 : vector<1x8x4xf32> to vector<8x4xf32>
    %cst_10 = arith.constant dense<0.000000e+00> : vector<8x128xf32>
    %10 = tpu.matmul %9, %7, %cst_10 {dimension_numbers = #tpu.dot_dimension_numbers<[1], [0], [0], [1], [0, 0, 1, 1], [], []>} : vector<8x4xf32>, vector<4x128xf32>, vector<8x128xf32> -> vector<8x128xf32>
    %11 = arith.addf %6, %10 : vector<8x128xf32>
    %12 = vector.extract_strided_slice %5 {offsets = [0, 1], sizes = [4, 128], strides = [1, 1]} : vector<4x256xf32> to vector<4x128xf32>
    %c1 = arith.constant 1 : index
    %c0_11 = arith.constant 0 : index
    %c0_12 = arith.constant 0 : index
    %13 = vector.load %arg4[%c1, %c0_11, %c0_12] : memref<3x8x4xf32, #tpu.memory_space<vmem>>, vector<1x8x4xf32>
    %14 = vector.shape_cast %13 : vector<1x8x4xf32> to vector<8x4xf32>
    %cst_13 = arith.constant dense<0.000000e+00> : vector<8x128xf32>
    %15 = tpu.matmul %14, %12, %cst_13 {dimension_numbers = #tpu.dot_dimension_numbers<[1], [0], [0], [1], [0, 0, 1, 1], [], []>} : vector<8x4xf32>, vector<4x128xf32>, vector<8x128xf32> -> vector<8x128xf32>
    %16 = arith.addf %11, %15 : vector<8x128xf32>
    %17 = vector.extract_strided_slice %5 {offsets = [0, 2], sizes = [4, 128], strides = [1, 1]} : vector<4x256xf32> to vector<4x128xf32>
    %c2 = arith.constant 2 : index
    %c0_14 = arith.constant 0 : index
    %c0_15 = arith.constant 0 : index
    %18 = vector.load %arg4[%c2, %c0_14, %c0_15] : memref<3x8x4xf32, #tpu.memory_space<vmem>>, vector<1x8x4xf32>
    %19 = vector.shape_cast %18 : vector<1x8x4xf32> to vector<8x4xf32>
    %cst_16 = arith.constant dense<0.000000e+00> : vector<8x128xf32>
    %20 = tpu.matmul %19, %17, %cst_16 {dimension_numbers = #tpu.dot_dimension_numbers<[1], [0], [0], [1], [0, 0, 1, 1], [], []>} : vector<8x4xf32>, vector<4x128xf32>, vector<8x128xf32> -> vector<8x128xf32>
    %21 = arith.addf %16, %20 : vector<8x128xf32>
    %22 = vector.broadcast %0 : vector<8x1xf32> to vector<8x128xf32>
    %23 = arith.addf %21, %22 : vector<8x128xf32>
    %c0_17 = arith.constant 0 : index
    %c0_18 = arith.constant 0 : index
    %c0_19 = arith.constant 0 : index
    %24 = vector.load %arg6[%c0_17, %c0_18, %c0_19] : memref<1x8x128xf32, #tpu.memory_space<vmem>>, vector<1x8x128xf32>
    %25 = vector.shape_cast %24 : vector<1x8x128xf32> to vector<8x128xf32>
    %26 = vector.shape_cast %23 : vector<8x128xf32> to vector<1x8x128xf32>
    tpu.vector_store %arg6[%c0_17, %c0_18, %c0_19], %26 {strides = array<i32>} : memref<1x8x128xf32, #tpu.memory_space<vmem>>, vector<1x8x128xf32>,
    return
  }
  func.func @transform_0(%arg0: i32, %arg1: i32) -> (i32, i32, i32) {
    %c0_i32 = arith.constant 0 : i32
    %c0_i32_0 = arith.constant 0 : i32
    return %arg0, %c0_i32, %arg1 : i32, i32, i32
  }
  func.func @transform_1(%arg0: i32, %arg1: i32) -> (i32, i32, i32) {
    %c1_i32 = arith.constant 1 : i32
    %0 = arith.addi %arg1, %c1_i32 : i32
    %c1_i32_0 = arith.constant 1 : i32
    %1 = arith.muli %0, %c1_i32_0 : i32
    %c0_i32 = arith.constant 0 : i32
    %c0_i32_1 = arith.constant 0 : i32
    return %arg0, %c0_i32, %1 : i32, i32, i32
  }
  func.func @transform_2(%arg0: i32, %arg1: i32) -> (i32, i32, i32) {
    %c0_i32 = arith.constant 0 : i32
    %c0_i32_0 = arith.constant 0 : i32
    %c0_i32_1 = arith.constant 0 : i32
    %c0_i32_2 = arith.constant 0 : i32
    return %c0_i32, %c0_i32_0, %c0_i32_1 : i32, i32, i32
  }
  func.func @transform_3(%arg0: i32, %arg1: i32) -> (i32, i32) {
    %c0_i32 = arith.constant 0 : i32
    %c0_i32_0 = arith.constant 0 : i32
    %c0_i32_1 = arith.constant 0 : i32
    return %c0_i32, %c0_i32_0 : i32, i32
  }
  func.func @transform_4(%arg0: i32, %arg1: i32) -> (i32, i32, i32) {
    %c0_i32 = arith.constant 0 : i32
    %c0_i32_0 = arith.constant 0 : i32
    return %arg0, %c0_i32, %arg1 : i32, i32, i32
  }
}

</mosaic_0001>

<bundles_post_ra>
// kernel: tpu_custom_call.1
= control target key start
LH: loop header
LB: loop body
LE: loop exit
PB: predicated region body
PF: predicated region fallthrough
CT: control target
= control target key end

     0   :  { %9 = vsyncpa [#allocation3], 0  ;;  %s978_s0 = inlined_call_operand.vmem [shape: f32[2,4,256], index: 0, kind: input, shape index: {}]   ;;  %s979_s1 = inlined_call_operand.vmem [shape: f32[2,4,256], index: 1, kind: input, shape index: {}]   ;;  %s980_s2 = inlined_call_operand.vmem [shape: f32[3,8,4], index: 2, kind: input, shape index: {}]   ;;  %s981_s3 = inlined_call_operand.vmem [shape: f32[8,1], index: 3, kind: input, shape index: {}]   ;;  %s982_s4 = inlined_call_operand.hbm [shape: f32[2,8,128], index: 4, kind: output, shape index: {}]  }
   0x1   :  { %11 = vsyncpa [#allocation3 + $0x1], 0  ;;  %s842_s15 = smov 0   ;;  %s844_s16 = smov 0  }
   0x2   :  { %s846_s17 = smov 0   ;;  %s848_s18 = smov 0  }
   0x3   :  { %s850_s19 = smov 0   ;;  %s852_s20 = smov 0  }
   0x4 LB: > { %s623_s21 = sadd.s32 4294967295, %s809_s20   ;;  %s624_s22 = sadd.s32 4294967294, %s809_s20   ;;  %s809_s20 = sphi %s852_s20, %s17_s20   ;;  %s805_s19 = sphi %s850_s19, %s989_s19   ;;  %s801_s18 = sphi %s848_s18, %s988_s18   ;;  %s797_s17 = sphi %s846_s17, %s987_s17   ;;  %s793_s16 = sphi %s844_s16, %s986_s16   ;;  %s789_s15 = sphi %s842_s15, %s985_s15  }
   0x5   : > { %s29_s23 = sadd.s32 1, %s805_s19  ;;  %s138_s24 = sadd.s32 1, %s797_s17 }
   0x6   : > { %p31_p0 = scmp.ge.s32.totalorder %s29_s23, 2  ;;  %p148_p1 = scmp.ne.s32.totalorder %s797_s17, %s793_s16 }
   0x7   : > { %p149_p2 = scmp.eq.s32.totalorder %s623_s21, 1  ;;  %p154_p3 = scmp.ne.s32.totalorder %s793_s16, %s789_s15 }
   0x8   : > { %s991_s23 = smov (%p31_p0, %s29_s23), 0  ;;  %p155_p5 = scmp.eq.s32.totalorder %s624_s22, 1 }
   0x9   : > { %p882_p4 = por %p149_p2, %p148_p1  ;;  %s133_s26 = ssub.s32 %s805_s19, %s991_s23 }
   0xa   : > { %p627_p6 = scmp.ge.s32.totalorder %s809_s20, 1  ;;  %p136_p7 = scmp.eq.s32.totalorder %s133_s26, 0 }
   0xb   : > { %p889_p8 = por %p155_p5, %p154_p3  ;;  %p203_p9 = scmp.lt.s32.totalorder %s809_s20, 3 }
   0xc   : > { %s895_s28 = scalar_select %p136_p7, %s797_s17, %s138_s24  }
   0xd   : > { %p204_p10 = pnand %p627_p6, %p203_p9 }
   0xe   : > { %p241_p11 = scmp.lt.s32.totalorder (!%p204_p10), %s801_s18, 1  ;;  %v811_v0 = vmov (!%p204_p10), 0.0   ;;  %vm812_vm0 = vmmov (!%p204_p10), 0   ;;  %vm277_vm1 = vcmask (!%p204_p10), 1043456   ;;  %v813_v1 = vmov (!%p204_p10), 0   ;;  %v262_v3 = vld [vmem:[%s980_s2] sm:$0xff] (!%p204_p10) }
   0xf   : > { %207 = sbr.rel (%p204_p10) target bundleno = 382 (0x17e), region = 36  ;;  %655 = vmatprep.subr.mxu0 (!%p204_p10), %v811_v0  ;;  %660 = vmatprep.subr.mxu1 (!%p204_p10), %v811_v0  ;;  %vm273_vm2 = vcmask (!%p204_p10), 31744   ;;  %s814_s14 = smov (!%p204_p10), 126   ;;  %v259_v5 = vld [vmem:[%s981_s3] sm:$0xff] (!%p204_p10)  ;;  %vm271_vm3 = vcmask (!%p204_p10), 1039360   ;;  %vm431_vm4 = vcmask (!%p204_p10), 1031168  }
  0x10   : > { %657 = vmatprep.mubr.msk.f32.mxu0 (!%p204_p10), %vm812_vm0, %v811_v0  ;;  %662 = vmatprep.mubr.msk.f32.mxu1 (!%p204_p10), %vm812_vm0, %v811_v0  ;;  %s815_s21 = smov (!%p204_p10), 127   ;;  %v633_v10 = vld [vmem:[%s980_s2 + $0x8] sm:$0xff] (!%p204_p10)  ;;  %v638_v13 = vld [vmem:[%s980_s2 + $0x10] sm:$0xff] (!%p204_p10)  ;;  %s238_s6 = sand.u32 (!%p204_p10), 1, %s793_s16  }
  0x11   : > { %730 = vset.pattern.permute.xlu0 (!%p204_p10), %v813_v1 }
  0x16   : > { %s242_s29 = scalar_select %p241_p11, %s801_s18, 1 }
  0x18   : > { %s645_s30 = sshll.u32 %s242_s29, 3 }
  0x19   : > { %s248_s7 = scalar_lea.vmem %s978_s0, %s645_s30  ;;  %s647_s8 = sadd.s32 4, %s645_s30 }
  0x1a   : > { %v260_v2 = vld [vmem:[%s248_s7] sm:$0xf]  ;;  %s257_s11 = scalar_lea.vmem %s979_s1, %s647_s8  ;;  %s628_s7 = sshll.u32 %s238_s6, 3 }
  0x1b   : > { %427 = vrot.lane.b32.xlu1 %v260_v2, %s814_s14  ;;  %267 = vrot.lane.b32.xlu0 %v260_v2, %s815_s21  ;;  %v261_v4 = vld [vmem:[%s257_s11] sm:$0xf]  ;;  %s642_s8 = sshll.u32 %s801_s18, 7  ;;  %s240_s9 = scalar_lea.vmem [#allocation2], %s628_s7 }
  0x1c   : > { %661 = vmatpush3.msk.msra.mxu1 %vm277_vm1, %v260_v2  ;;  %s531_s10 = sshll.u32 %s240_s9, 4  ;;  %s931_s13 = scalar_lea.hbm %s982_s4, %s642_s8  ;;  %s933_s10 = int_to_ptr.vmem [resolvable:$true] %s531_s10 }
  0x1d   : > { %663 = vmatmul.mubr.msk.f32.vlgmr.msra.gmra.mrb[0].mxu1 %vm273_vm2, %v262_v3  ;;  %s816_s18 = smov [#allocation2]  }
  0x1e   : > { %s735_s22 = sshll.u32 %s816_s18, 4  ;;  %s736_s22 = int_to_ptr.vmem [resolvable:$false] %s735_s22 }
  0x1f   : > { %429 = vrot.lane.b32.xlu1 %v261_v4, %s814_s14  ;;  %269 = vrot.lane.b32.xlu0 %v261_v4, %s815_s21  ;;  %s517_s14 = scalar_lea.sflag [#allocation3], %s238_s6  ;;  %s731_s21 = scalar_lea.vmem %s933_s10, 128 }
  0x20   : > { %p732_p12 = scmp.ne.s32.totalorder %s933_s10, %s731_s21  ;;  %s737_s24 = scalar_lea.vmem %s736_s22, 256 }
  0x21   : > { %p738_p1 = scmp.lt.s32.totalorder %s933_s10, %s736_s22  ;;  %p739_p2 = scmp.lt.s32.totalorder %s737_s24, %s731_s21 }
  0x22   : > { %p733_p13 = pnand %p732_p12, %p882_p4 }
  0x23   : > { %511 = vperm.xlu0 %730, %v259_v5   ;;  %p740_p3 = por %p739_p2, %p738_p1 }
  0x24   : > { %p734_p0 = pneg %p733_p13 }
  0x26   : > { %p741_p5 = pnand %p740_p3, %p734_p0 }
  0x8d   : > { %v428_v6 = vpop.permute.xlu1 %427  ;;  %v268_v7 = vpop.permute.xlu0 %267 }
  0x91   : > { %v430_v8 = vpop.permute.xlu1 %429  ;;  %v270_v9 = vpop.permute.xlu0 %269 }
  0x92   : > { %v272_v11 = vsel %vm271_vm3, %v268_v7, %v270_v9  ;;  %v432_v12 = vsel %vm431_vm4, %v428_v6, %v430_v8 }
  0x93   : > { %656 = vmatpush3.msk.msra.mxu0 %vm277_vm1, %v272_v11 }
  0x94   : > { %658 = vmatmul.mubr.msk.f32.vlgmr.msra.gmra.mrb[0].mxu0 %vm273_vm2, %v633_v10  ;;  %665 = vmatprep.subr.mxu0 %v811_v0 }
  0x95   : > { %666 = vmatpush3.msk.msra.mxu0 %vm277_vm1, %v432_v12  ;;  %667 = vmatprep.mubr.msk.f32.mxu0 %vm812_vm0, %v811_v0 }
  0x98   : > { %668 = vmatmul.mubr.msk.f32.vlgmr.msra.gmra.mrb[2].mxu0 %vm273_vm2, %v638_v13 }
  0xa2   : > { %v512_v20 = vpop.permute.xlu0 %511 }
  0xf0   : > { %v421_v14 = vpop.f32.mrb[0].mxu1 }
  0xf1   : > { %v664_v15 = vpop.f32.mrb[1].mxu1 }
 0x167   : > { %v346_v16 = vpop.f32.mrb[0].mxu0 }
 0x168   : > { %v659_v17 = vpop.f32.mrb[1].mxu0  ;;  %v422_v18 = vadd.f32 %v421_v14, %v346_v16 }
 0x16b   : > { %v504_v19 = vpop.f32.mrb[2].mxu0 }
 0x16c   : > { %v508_v21 = vadd.f32 %v504_v19, %v422_v18  ;;  %v669_v22 = vpop.f32.mrb[3].mxu0 }
 0x16e   : > { %v514_v23 = vadd.f32 %v512_v20, %v508_v21 }
 0x170   : > { %515 = vst [vmem:[%s240_s9] sm:$0xff] %v514_v23 }
 0x171   : > { %744 = shalt.err (!%p741_p5)
}
 0x172   : > { %s745_s26 = scalar_lea.hbm %s931_s13, 128  ;;  %s749_s5 = scalar_lea.hbm %s982_s4, 256 }
 0x173   : > { %p746_p6 = scmp.ne.s32.totalorder %s931_s13, %s745_s26  ;;  %p750_p10 = scmp.lt.u32.totalorder %s931_s13, %s982_s4 }
 0x174   : > { %p751_p11 = scmp.lt.u32.totalorder %s749_s5, %s745_s26  ;;  %p753_p13 = scmp.lt.u32.totalorder %s745_s26, %s931_s13 }
 0x175   : > { %p747_p7 = pnand %p746_p6, %p882_p4 }
 0x176   : > { %p752_p12 = por %p751_p11, %p750_p10 }
 0x177   : > { %p748_p9 = pneg %p747_p7 }
 0x178   : > { %p754_p0 = por %p753_p13, %p752_p12 }
 0x17a   : > { %p755_p1 = pnand %p754_p0, %p748_p9 }
 0x17c   : > { %758 = shalt.err (!%p755_p1)
}
 0x17d   : > { %670 = dma.vmem_to_hbm [thread:$0]  (%p882_p4), %s933_s10, 128, %s931_s13, %s517_s14  }
 0x17e PF: > { %p676_p2 = scmp.ge.s32.totalorder %s809_s20, 2  ;;  %s543_s8 = sand.u32 1, %s789_s15  }
 0x17f   : > { %s544_s9 = scalar_lea.sflag [#allocation3], %s543_s8 }
 0x180   : > { %p673_p3 = pnand %p676_p2, %p889_p8 }
 0x182   : > { %784 = dma.done.wait (!%p673_p3), %s544_s9, 128  }
 0x183   : > { %786 = vsyncadd (!%p673_p3), %s544_s9, 4294967168  ;;  %s17_s20 = sadd.s32 1, %s809_s20   ;;  %s985_s15 = smov %s793_s16 }
 0x184   : > { %p14_p5 = scmp.ge.s32.totalorder %s17_s20, 4   ;;  %s986_s16 = smov %s797_s17 }
 0x185   : > { %s987_s17 = smov %s895_s28  ;;  %s988_s18 = smov %s805_s19 }
 0x186   : > { %s989_s19 = smov %s991_s23  ;;  %16 = sbr.rel (!%p14_p5) target bundleno = 4 (0x4), region = 76 }
 0x18d   :  { %549 = vsyncpa [#allocation3], 1 }
 0x18e   :  { %551 = vsyncpa [#allocation3 + $0x1], 1 }

</bundles_post_ra>
